<compile_context>
chip_gen: v5e
topology: v5e:2x2
jax: 0.10.0
libtpu: 0.0.40
codegen_flags: <defaults>
</compile_context>

<pallas_src>
import functools

import jax
import jax.numpy as jnp
from jax.experimental import pallas as pl
from jax.experimental.pallas import tpu as pltpu


def _round_up(n, m):
    return ((n + m - 1) // m) * m


def _nonlinear_kernel(x_ref, o_ref, *, model, d, lane_packed):
    x = x_ref[...]                       # (block_rows, lane_w)

    if model is None or model == "linear":
        o_ref[...] = x
        return

    xf = x.astype(jnp.float32)           # f32 accumulation (exact for f32 input,
                                         # avoids drift for x**i with i up to D-1)

    if model == "sin":
        o_ref[...] = (jnp.sin(4.0 * xf) + 5.0 * xf).astype(o_ref.dtype)
        return
    if model == "cnae":
        o_ref[...] = (5.0 * jax.nn.sigmoid(xf) + 0.3 * xf).astype(o_ref.dtype)
        return

    # model == 'tanh':  y[..., i] = i * tanh(x[..., i] ** i)
    # Component index depends only on the lane (sublane-invariant), so the integer
    # bit-mask work runs on a single (1, lane_w) row and broadcasts for free.
    lane_w = x.shape[-1]
    lane_iota = jax.lax.broadcasted_iota(jnp.int32, (1, lane_w), dimension=1)
    e = lane_iota % d if lane_packed else lane_iota      # component index per lane

    # Exponentiation by squaring with a lane-dependent exponent (reproduces
    # torch's x**0 == 1, including 0**0 == 1).
    p = jnp.ones_like(xf)
    base = xf
    nbits = max(1, (d - 1).bit_length())
    for b in range(nbits):
        bit_set = ((e >> b) & 1) == 1                    # (1, lane_w) bool, broadcast
        p = jnp.where(bit_set, p * base, p)
        if b < nbits - 1:                                # skip dead final squaring
            base = base * base

    y = e.astype(jnp.float32) * jnp.tanh(p)              # (1,lane_w) * (rows,lane_w)
    o_ref[...] = y.astype(o_ref.dtype)


def _choose_block_rows(rows, lane_w, itemsize, sub, max_block_rows):
    # ~1 MiB per block per array -> ~4 MiB live with double-buffered in+out.
    budget_bytes = 1 << 20
    cap = max(sub, (budget_bytes // max(lane_w * itemsize, 1)) // sub * sub)
    return max(sub, min(max_block_rows, cap, _round_up(rows, sub)))


@functools.partial(jax.jit, static_argnames=("model", "max_block_rows"))
def nonlinear_component_wise(x, *, model="tanh", max_block_rows=2048):
    """Pallas forward of Network.forward for the chosen `model` nonlinearity."""
    orig_shape = x.shape
    D = orig_shape[-1]
    dtype = x.dtype
    n_elems = x.size
    itemsize = jnp.dtype(dtype).itemsize

    # Sublane packing granularity: 8 rows for 4-byte types, 16 for bf16, 32 for int8.
    sub = 8 * max(1, 4 // max(itemsize, 1))

    # Lane-dense packing is valid whenever the per-lane component index can be
    # recovered (128 % D == 0) or is not needed (non-'tanh' models).
    use_lane_pack = (D < 128) and ((model != "tanh") or (128 % D == 0))

    if use_lane_pack:
        lane_w = 128
        rows = pl.cdiv(n_elems, lane_w)
        block_rows = _choose_block_rows(rows, lane_w, itemsize, sub, max_block_rows)
        rows_padded = _round_up(rows, block_rows)
        flat = x.reshape(-1)
        pad = rows_padded * lane_w - n_elems
        if pad:
            flat = jnp.pad(flat, (0, pad))
        x2 = flat.reshape(rows_padded, lane_w)
    else:
        # lane_w == D equals the full last dim of the array, so the (8,128)
        # block-shape constraint is satisfied even for odd D.  (Sub-128 D that
        # doesn't divide 128 under 'tanh' pays masked stores; correctness holds.)
        lane_w = D
        x2 = x.reshape(-1, D)
        rows = x2.shape[0]
        block_rows = _choose_block_rows(rows, lane_w, itemsize, sub, max_block_rows)
        rows_padded = _round_up(rows, block_rows)
        if rows_padded != rows:
            x2 = jnp.pad(x2, ((0, rows_padded - rows), (0, 0)))

    grid = (rows_padded // block_rows,)
    kernel = functools.partial(
        _nonlinear_kernel, model=model, d=D, lane_packed=use_lane_pack
    )

    out = pl.pallas_call(
        kernel,
        out_shape=jax.ShapeDtypeStruct((rows_padded, lane_w), dtype),
        grid=grid,
        in_specs=[pl.BlockSpec((block_rows, lane_w), lambda i: (i, 0))],
        out_specs=pl.BlockSpec((block_rows, lane_w), lambda i: (i, 0)),
        compiler_params=pltpu.CompilerParams(
            dimension_semantics=("parallel",),  # shards row grid across v7x's 2 TCs
        ),
    )(x2)

    if use_lane_pack:
        return out.reshape(-1)[:n_elems].reshape(orig_shape)
    return out[:rows].reshape(orig_shape)


def _reference_forward(x, model="tanh"):
    """Pure-JAX replica of the PyTorch forward (per-component loop + concat)."""
    cols = []
    for i in range(x.shape[-1]):
        xi = x[..., i : i + 1]
        if model == "tanh":
            cols.append(i * jnp.tanh(xi ** i))
        elif model == "sin":
            cols.append(jnp.sin(4 * xi) + 5 * xi)
        elif model == "cnae":
            cols.append(5 * jax.nn.sigmoid(xi) + 0.3 * xi)
        else:
            cols.append(xi)
    return jnp.concatenate(cols, axis=-1)


if __name__ == "__main__":
    # Module hyper-parameters (synthetic, deterministic)
    latent_dim = 16
    observed_dim = 16
    degree = 3

    key = jax.random.PRNGKey(0)
    k_coef, k_x = jax.random.split(key)

    # coefficients: (observed_dim, degree+1) -- created in __init__, unused in forward()
    coefficients = jax.random.uniform(k_coef, (observed_dim, degree + 1), jnp.float32)

    # Example input: (batch=2, seq=8, observed_dim=16)
    x = jax.random.normal(k_x, (2, 8, observed_dim), jnp.float32)

    ok = True
    for model in ("tanh", "sin", "cnae", "linear"):
        y = nonlinear_component_wise(x, model=model)
        y = jax.block_until_ready(y)
        y_ref = _reference_forward(x, model=model)
        assert y.shape == x.shape and y.dtype == x.dtype
        ok &= bool(jnp.allclose(y, y_ref, atol=1e-4, rtol=1e-4))

    assert ok, "mismatch vs reference"
    print("KERNEL_OK")
</pallas_src>

<mosaic_0001>
module attributes {stable_mosaic.version = 11 : i64} {
  func.func @_nonlinear_kernel(%arg0: i32, %arg1: memref<8x128xf32, #tpu.memory_space<vmem>>, %arg2: memref<8x128xf32, #tpu.memory_space<vmem>>) attributes {dimension_semantics = [#tpu.dimension_semantics<parallel>], iteration_bounds = array<i64: 1>, scalar_prefetch = 0 : i64, scratch_operands = 0 : i64, tpu.core_type = #tpu.core_type<tc>, window_params = [{transform_indices = @transform_0, window_bounds = array<i64: 8, 128>}, {transform_indices = @transform_1, window_bounds = array<i64: 8, 128>}]} {
    %c0 = arith.constant 0 : index
    %c0_0 = arith.constant 0 : index
    %0 = vector.load %arg1[%c0, %c0_0] : memref<8x128xf32, #tpu.memory_space<vmem>>, vector<8x128xf32>
    %1 = tpu.iota {dimensions = array<i32: 1>} : vector<1x128xi32>
    %c16_i32 = arith.constant 16 : i32
    %c0_i32 = arith.constant 0 : i32
    %2 = arith.cmpi eq, %c16_i32, %c0_i32 : i32
    %c1_i32 = arith.constant 1 : i32
    %3 = arith.select %2, %c1_i32, %c16_i32 : i32
    %4 = vector.broadcast %3 : i32 to vector<1x128xi32>
    %5 = arith.remsi %1, %4 : vector<1x128xi32>
    %c0_i32_1 = arith.constant 0 : i32
    %6 = vector.broadcast %c0_i32_1 : i32 to vector<1x128xi32>
    %7 = arith.cmpi ne, %5, %6 : vector<1x128xi32>
    %c0_i32_2 = arith.constant 0 : i32
    %8 = vector.broadcast %c0_i32_2 : i32 to vector<1x128xi32>
    %9 = arith.cmpi slt, %5, %8 : vector<1x128xi32>
    %c0_i32_3 = arith.constant 0 : i32
    %10 = arith.cmpi slt, %3, %c0_i32_3 : i32
    %11 = vector.broadcast %10 : i1 to vector<1x128xi1>
    %12 = vector.broadcast %11 : vector<1x128xi1> to vector<1x128xi1>
    %13 = arith.xori %9, %12 : vector<1x128xi1>
    %14 = arith.andi %13, %7 : vector<1x128xi1>
    %15 = vector.broadcast %3 : i32 to vector<1x128xi32>
    %16 = arith.addi %5, %15 : vector<1x128xi32>
    %17 = arith.select %14, %16, %5 : vector<1x128xi1>, vector<1x128xi32>
    %cst = arith.constant 1.000000e+00 : f32
    %18 = vector.broadcast %cst : f32 to vector<8x128xf32>
    %c0_i32_4 = arith.constant 0 : i32
    %19 = vector.broadcast %c0_i32_4 : i32 to vector<1x128xi32>
    %20 = arith.shrsi %17, %19 : vector<1x128xi32>
    %c1_i32_5 = arith.constant 1 : i32
    %21 = vector.broadcast %c1_i32_5 : i32 to vector<1x128xi32>
    %22 = arith.andi %20, %21 : vector<1x128xi32>
    %c1_i32_6 = arith.constant 1 : i32
    %23 = vector.broadcast %c1_i32_6 : i32 to vector<1x128xi32>
    %24 = arith.cmpi eq, %22, %23 : vector<1x128xi32>
    %25 = arith.mulf %18, %0 : vector<8x128xf32>
    %26 = vector.shape_cast %24 : vector<1x128xi1> to vector<1x128xi1>
    %27 = vector.broadcast %26 : vector<1x128xi1> to vector<8x128xi1>
    %28 = arith.select %27, %25, %18 : vector<8x128xi1>, vector<8x128xf32>
    %29 = arith.mulf %0, %0 : vector<8x128xf32>
    %c1_i32_7 = arith.constant 1 : i32
    %30 = vector.broadcast %c1_i32_7 : i32 to vector<1x128xi32>
    %31 = arith.shrsi %17, %30 : vector<1x128xi32>
    %c1_i32_8 = arith.constant 1 : i32
    %32 = vector.broadcast %c1_i32_8 : i32 to vector<1x128xi32>
    %33 = arith.andi %31, %32 : vector<1x128xi32>
    %c1_i32_9 = arith.constant 1 : i32
    %34 = vector.broadcast %c1_i32_9 : i32 to vector<1x128xi32>
    %35 = arith.cmpi eq, %33, %34 : vector<1x128xi32>
    %36 = arith.mulf %28, %29 : vector<8x128xf32>
    %37 = vector.shape_cast %35 : vector<1x128xi1> to vector<1x128xi1>
    %38 = vector.broadcast %37 : vector<1x128xi1> to vector<8x128xi1>
    %39 = arith.select %38, %36, %28 : vector<8x128xi1>, vector<8x128xf32>
    %40 = arith.mulf %29, %29 : vector<8x128xf32>
    %c2_i32 = arith.constant 2 : i32
    %41 = vector.broadcast %c2_i32 : i32 to vector<1x128xi32>
    %42 = arith.shrsi %17, %41 : vector<1x128xi32>
    %c1_i32_10 = arith.constant 1 : i32
    %43 = vector.broadcast %c1_i32_10 : i32 to vector<1x128xi32>
    %44 = arith.andi %42, %43 : vector<1x128xi32>
    %c1_i32_11 = arith.constant 1 : i32
    %45 = vector.broadcast %c1_i32_11 : i32 to vector<1x128xi32>
    %46 = arith.cmpi eq, %44, %45 : vector<1x128xi32>
    %47 = arith.mulf %39, %40 : vector<8x128xf32>
    %48 = vector.shape_cast %46 : vector<1x128xi1> to vector<1x128xi1>
    %49 = vector.broadcast %48 : vector<1x128xi1> to vector<8x128xi1>
    %50 = arith.select %49, %47, %39 : vector<8x128xi1>, vector<8x128xf32>
    %51 = arith.mulf %40, %40 : vector<8x128xf32>
    %c3_i32 = arith.constant 3 : i32
    %52 = vector.broadcast %c3_i32 : i32 to vector<1x128xi32>
    %53 = arith.shrsi %17, %52 : vector<1x128xi32>
    %c1_i32_12 = arith.constant 1 : i32
    %54 = vector.broadcast %c1_i32_12 : i32 to vector<1x128xi32>
    %55 = arith.andi %53, %54 : vector<1x128xi32>
    %c1_i32_13 = arith.constant 1 : i32
    %56 = vector.broadcast %c1_i32_13 : i32 to vector<1x128xi32>
    %57 = arith.cmpi eq, %55, %56 : vector<1x128xi32>
    %58 = arith.mulf %50, %51 : vector<8x128xf32>
    %59 = vector.shape_cast %57 : vector<1x128xi1> to vector<1x128xi1>
    %60 = vector.broadcast %59 : vector<1x128xi1> to vector<8x128xi1>
    %61 = arith.select %60, %58, %50 : vector<8x128xi1>, vector<8x128xf32>
    %62 = arith.sitofp %17 : vector<1x128xi32> to vector<1x128xf32>
    %63 = math.tanh %61 : vector<8x128xf32>
    %64 = vector.broadcast %62 : vector<1x128xf32> to vector<8x128xf32>
    %65 = arith.mulf %64, %63 : vector<8x128xf32>
    %c0_14 = arith.constant 0 : index
    %c0_15 = arith.constant 0 : index
    %66 = vector.load %arg2[%c0_14, %c0_15] : memref<8x128xf32, #tpu.memory_space<vmem>>, vector<8x128xf32>
    tpu.vector_store %arg2[%c0_14, %c0_15], %65 {strides = array<i32>} : memref<8x128xf32, #tpu.memory_space<vmem>>, vector<8x128xf32>,
    return
  }
  func.func @transform_0(%arg0: i32) -> (i32, i32) {
    %c0_i32 = arith.constant 0 : i32
    %c0_i32_0 = arith.constant 0 : i32
    return %arg0, %c0_i32 : i32, i32
  }
  func.func @transform_1(%arg0: i32) -> (i32, i32) {
    %c0_i32 = arith.constant 0 : i32
    %c0_i32_0 = arith.constant 0 : i32
    return %arg0, %c0_i32 : i32, i32
  }
}

</mosaic_0001>

<bundles_post_ra>
// kernel: nonlinear_component_wise.1
= control target key start
LH: loop header
LB: loop body
LE: loop exit
PB: predicated region body
PF: predicated region fallthrough
CT: control target
= control target key end

     0   :  { %v9_v0 = vlaneseq  ;;  %s78_s0 = inlined_call_operand.vmem [shape: f32[8,128], index: 0, kind: input, shape index: {}]   ;;  %s79_s1 = inlined_call_operand.vmem [shape: f32[8,128], index: 1, kind: output, shape index: {}]  }
   0x1   :  { %v8_v1 = vld [vmem:[%s78_s0] sm:$0xff] }
   0x2   :  { %v10_v2 = vand.u32 127, %v9_v0  ;;  %v28_v4 = vmul.f32 %v8_v1, %v8_v1 }
   0x4   :  { %v15_v3 = vand.u32 15, %v10_v2  ;;  %v36_v10 = vmul.f32 %v28_v4, %v28_v4 }
   0x6   :  { %v23_v5 = vand.u32 1, %v15_v3  ;;  %v29_v6 = vshra.s32 %v15_v3, 1  ;;  %v37_v7 = vshra.s32 %v15_v3, 2  ;;  %v45_v8 = vshra.s32 %v15_v3, 3 }
   0x7   :  { %v44_v16 = vmul.f32 %v36_v10, %v36_v10  ;;  %v52_v21 = vcvt.s32.f32 %v15_v3 }
   0x8   :  { %vm24_vm0 = vcmp.eq.s32.totalorder %v23_v5, 1  ;;  %v30_v9 = vand.u32 1, %v29_v6  ;;  %v38_v11 = vand.u32 1, %v37_v7  ;;  %v46_v14 = vand.u32 1, %v45_v8 }
   0x9   :  { %v27_v12 = vsel %vm24_vm0, %v8_v1, 1.0 }
   0xa   :  { %vm31_vm1 = vcmp.eq.s32.totalorder %v30_v9, 1  ;;  %v32_v13 = vmul.f32 %v28_v4, %v27_v12  ;;  %vm39_vm2 = vcmp.eq.s32.totalorder %v38_v11, 1  ;;  %vm47_vm3 = vcmp.eq.s32.totalorder %v46_v14, 1 }
   0xc   :  { %v35_v15 = vsel %vm31_vm1, %v32_v13, %v27_v12 }
   0xd   :  { %v40_v17 = vmul.f32 %v36_v10, %v35_v15 }
   0xf   :  { %v43_v18 = vsel %vm39_vm2, %v40_v17, %v35_v15 }
  0x10   :  { %v48_v19 = vmul.f32 %v44_v16, %v43_v18 }
  0x12   :  { %v51_v20 = vsel %vm47_vm3, %v48_v19, %v43_v18 }
  0x13   :  { %60 = vtanh.f32 %v51_v20 }
  0x19   :  { %v61_v22 = vpop.eup %60 }
  0x1a   :  { %v54_v23 = vmul.f32 %v61_v22, %v52_v21 }
  0x1c   :  { %55 = vst [vmem:[%s79_s1] sm:$0xff] %v54_v23 }

</bundles_post_ra>
